<compile_context>
chip_gen: v6e
topology: v6e:2x2x1
jax: 0.10.0
libtpu: 0.0.40
codegen_flags: <defaults>
</compile_context>

<pallas_src>
import jax
import jax.numpy as jnp
from jax.experimental import pallas as pl
from jax.experimental.pallas import tpu as pltpu

LANES = 128
TARGET_BLOCK_ROWS = 2048  # 2048 * 128 * 4 B = 1 MiB per input block (f32)


def _make_awbce_kernel(valid_rows, block_rows, blocks_per_split, needs_mask):
    def kernel(pred_ref, label_ref, out_ref):
        s = pl.program_id(0)   # TensorCore split ("parallel")
        j = pl.program_id(1)   # reduction step ("arbitrary")

        @pl.when(j == 0)
        def _():
            out_ref[...] = jnp.zeros_like(out_ref)

        p = pred_ref[...].astype(jnp.float32)
        y = label_ref[...].astype(jnp.float32)

        # Adaptive weight (detached in torch; forward-only here anyway).
        w = jnp.abs(y - p) + jnp.float32(0.01)

        # PyTorch binary_cross_entropy clamps the log terms at -100.
        log_p = jnp.maximum(jnp.log(p), jnp.float32(-100.0))
        log_1mp = jnp.maximum(jnp.log(1.0 - p), jnp.float32(-100.0))
        per_elem = -w * (y * log_p + (1.0 - y) * log_1mp)

        if needs_mask:
            # Ragged last block / phantom split steps: zero rows that lie past
            # the real data (their block-padded values are unspecified).
            blk = s * blocks_per_split + j
            row = blk * block_rows + jax.lax.broadcasted_iota(
                jnp.int32, per_elem.shape, 0)
            per_elem = jnp.where(row < valid_rows, per_elem, jnp.float32(0.0))

        # Reduce the block to one vreg-shaped (8, 128) partial (pure VPU adds;
        # the single cross-lane reduce happens once, in the wrapper epilogue).
        partial = jnp.sum(per_elem.reshape(block_rows // 8, 8, LANES), axis=0)
        out_ref[...] += partial[None]

    return kernel


def awbce_loss(prediction, label):
    """Mean adaptive-weighted BCE, matching AWBCELoss.forward."""
    assert prediction.shape == label.shape
    n = prediction.size
    assert n > 0

    # Keep 2-/4-byte floats in their native dtype (upcast happens in-kernel).
    if (not jnp.issubdtype(prediction.dtype, jnp.floating)
            or jnp.dtype(prediction.dtype).itemsize not in (2, 4)):
        prediction = prediction.astype(jnp.float32)
    if label.dtype != prediction.dtype:
        label = label.astype(prediction.dtype)

    sublane = 8 if jnp.dtype(prediction.dtype).itemsize == 4 else 16
    chunk = sublane * LANES

    p = prediction.reshape(-1)
    y = label.reshape(-1)

    pad = (-n) % chunk
    if pad:
        # Rare ragged tail: pad with (p=0, y=0), which contributes exactly 0
        # (y=0 kills the clamped log(p) term, log(1-0)=0 kills the other).
        p = jnp.pad(p, (0, pad))
        y = jnp.pad(y, (0, pad))

    rows = (n + pad) // LANES            # multiple of `sublane`
    p2 = p.reshape(rows, LANES)
    y2 = y.reshape(rows, LANES)

    block_rows = min(TARGET_BLOCK_ROWS, rows)
    nblocks = pl.cdiv(rows, block_rows)
    nsplit = min(2, nblocks)             # shard the reduction over 2 TCs (v7x)
    bps = pl.cdiv(nblocks, nsplit)       # reduction steps per split
    needs_mask = (nsplit * bps * block_rows) != rows

    def in_index(s, j):
        b = s * bps + j
        if nsplit * bps > nblocks:       # clamp phantom trailing steps
            b = jnp.minimum(b, nblocks - 1)
        return (b, 0)

    tile_spec = pl.BlockSpec((block_rows, LANES), in_index)

    partials = pl.pallas_call(
        _make_awbce_kernel(rows, block_rows, bps, needs_mask),
        out_shape=jax.ShapeDtypeStruct((nsplit, 8, LANES), jnp.float32),
        grid_spec=pltpu.PrefetchScalarGridSpec(
            num_scalar_prefetch=0,
            grid=(nsplit, bps),
            in_specs=[tile_spec, tile_spec],
            out_specs=pl.BlockSpec((1, 8, LANES), lambda s, j: (s, 0, 0)),
        ),
        compiler_params=pltpu.CompilerParams(
            dimension_semantics=("parallel", "arbitrary"),
        ),
    )(p2, y2)

    # Tiny epilogue: one cross-lane reduce + mean division (true element count).
    return jnp.sum(partials) / jnp.float32(n)


def _reference(prediction, label):
    p = prediction.astype(jnp.float32)
    y = label.astype(jnp.float32)
    w = jnp.abs(y - p) + 0.01
    log_p = jnp.maximum(jnp.log(p), -100.0)
    log_1mp = jnp.maximum(jnp.log(1.0 - p), -100.0)
    return jnp.mean(-w * (y * log_p + (1.0 - y) * log_1mp))


if __name__ == "__main__":
    key = jax.random.PRNGKey(0)
    k1, k2, k3, k4 = jax.random.split(key, 4)

    # Primary check: NCHW shape typical for the module; n divisible by 8*128
    # -> pure reshape, no padding, single fat block.
    shape = (2, 4, 16, 16)
    prediction = jax.nn.sigmoid(jax.random.normal(k1, shape, dtype=jnp.float32))
    label = jax.random.uniform(k2, shape, dtype=jnp.float32)

    loss = jax.block_until_ready(awbce_loss(prediction, label))
    ref = _reference(prediction, label)
    assert jnp.allclose(loss, ref, rtol=1e-5, atol=1e-6), (loss, ref)

    # Secondary check: odd element count -> exercises the zero-pad tail path.
    shape2 = (2, 3, 7, 11)
    pred2 = jax.nn.sigmoid(jax.random.normal(k3, shape2, dtype=jnp.float32))
    lab2 = jax.random.uniform(k4, shape2, dtype=jnp.float32)
    loss2 = jax.block_until_ready(awbce_loss(pred2, lab2))
    ref2 = _reference(pred2, lab2)
    assert jnp.allclose(loss2, ref2, rtol=1e-5, atol=1e-6), (loss2, ref2)

    print("KERNEL_OK")
</pallas_src>

<mosaic_0001>
module attributes {stable_mosaic.version = 11 : i64} {
  func.func @kernel(%arg0: i32, %arg1: i32, %arg2: memref<16x128xf32, #tpu.memory_space<vmem>>, %arg3: memref<16x128xf32, #tpu.memory_space<vmem>>, %arg4: memref<1x8x128xf32, #tpu.memory_space<vmem>>) attributes {dimension_semantics = [#tpu.dimension_semantics<parallel>, #tpu.dimension_semantics<arbitrary>], iteration_bounds = array<i64: 1, 1>, scalar_prefetch = 0 : i64, scratch_operands = 0 : i64, tpu.core_type = #tpu.core_type<tc>, window_params = [{transform_indices = @transform_0, window_bounds = array<i64: 16, 128>}, {transform_indices = @transform_1, window_bounds = array<i64: 16, 128>}, {transform_indices = @transform_2, window_bounds = array<i64: 1, 8, 128>}]} {
    %c0_i32 = arith.constant 0 : i32
    %0 = arith.cmpi eq, %arg1, %c0_i32 : i32
    %1 = arith.extui %0 : i1 to i32
    %c0_i32_0 = arith.constant 0 : i32
    %2 = arith.cmpi ne, %1, %c0_i32_0 : i32
    scf.if %2 {
      %cst_16 = arith.constant 0.000000e+00 : f32
      %31 = vector.broadcast %cst_16 : f32 to vector<1x8x128xf32>
      %c0_17 = arith.constant 0 : index
      %c0_18 = arith.constant 0 : index
      %c0_19 = arith.constant 0 : index
      %32 = vector.load %arg4[%c0_17, %c0_18, %c0_19] : memref<1x8x128xf32, #tpu.memory_space<vmem>>, vector<1x8x128xf32>
      tpu.vector_store %arg4[%c0_17, %c0_18, %c0_19], %31 {strides = array<i32>} : memref<1x8x128xf32, #tpu.memory_space<vmem>>, vector<1x8x128xf32>,
    } else {
    }
    %c0 = arith.constant 0 : index
    %c0_1 = arith.constant 0 : index
    %3 = vector.load %arg2[%c0, %c0_1] : memref<16x128xf32, #tpu.memory_space<vmem>>, vector<16x128xf32>
    %c0_2 = arith.constant 0 : index
    %c0_3 = arith.constant 0 : index
    %4 = vector.load %arg3[%c0_2, %c0_3] : memref<16x128xf32, #tpu.memory_space<vmem>>, vector<16x128xf32>
    %5 = arith.subf %4, %3 : vector<16x128xf32>
    %6 = math.absf %5 : vector<16x128xf32>
    %cst = arith.constant 0.00999999977 : f32
    %7 = vector.broadcast %cst : f32 to vector<16x128xf32>
    %8 = arith.addf %6, %7 : vector<16x128xf32>
    %9 = math.log %3 : vector<16x128xf32>
    %cst_4 = arith.constant -1.000000e+02 : f32
    %10 = vector.broadcast %cst_4 : f32 to vector<16x128xf32>
    %11 = arith.maximumf %9, %10 : vector<16x128xf32>
    %cst_5 = arith.constant 1.000000e+00 : f32
    %12 = vector.broadcast %cst_5 : f32 to vector<16x128xf32>
    %13 = arith.subf %12, %3 : vector<16x128xf32>
    %14 = math.log %13 : vector<16x128xf32>
    %cst_6 = arith.constant -1.000000e+02 : f32
    %15 = vector.broadcast %cst_6 : f32 to vector<16x128xf32>
    %16 = arith.maximumf %14, %15 : vector<16x128xf32>
    %cst_7 = arith.constant 0.000000e+00 : f32
    %17 = vector.broadcast %cst_7 : f32 to vector<16x128xf32>
    %18 = arith.subf %17, %8 : vector<16x128xf32>
    %19 = arith.mulf %4, %11 : vector<16x128xf32>
    %cst_8 = arith.constant 1.000000e+00 : f32
    %20 = vector.broadcast %cst_8 : f32 to vector<16x128xf32>
    %21 = arith.subf %20, %4 : vector<16x128xf32>
    %22 = arith.mulf %21, %16 : vector<16x128xf32>
    %23 = arith.addf %19, %22 : vector<16x128xf32>
    %24 = arith.mulf %18, %23 : vector<16x128xf32>
    %25 = vector.shape_cast %24 : vector<16x128xf32> to vector<2x8x128xf32>
    %cst_9 = arith.constant dense<0.000000e+00> : vector<8x128xf32>
    %26 = vector.multi_reduction <add>, %25, %cst_9 [0] : vector<2x8x128xf32> to vector<8x128xf32>
    %c0_10 = arith.constant 0 : index
    %c0_11 = arith.constant 0 : index
    %c0_12 = arith.constant 0 : index
    %27 = vector.load %arg4[%c0_10, %c0_11, %c0_12] : memref<1x8x128xf32, #tpu.memory_space<vmem>>, vector<1x8x128xf32>
    %28 = vector.shape_cast %26 : vector<8x128xf32> to vector<1x8x128xf32>
    %29 = arith.addf %27, %28 : vector<1x8x128xf32>
    %c0_13 = arith.constant 0 : index
    %c0_14 = arith.constant 0 : index
    %c0_15 = arith.constant 0 : index
    %30 = vector.load %arg4[%c0_13, %c0_14, %c0_15] : memref<1x8x128xf32, #tpu.memory_space<vmem>>, vector<1x8x128xf32>
    tpu.vector_store %arg4[%c0_13, %c0_14, %c0_15], %29 {strides = array<i32>} : memref<1x8x128xf32, #tpu.memory_space<vmem>>, vector<1x8x128xf32>,
    return
  }
  func.func @transform_0(%arg0: i32, %arg1: i32) -> (i32, i32) {
    %c1_i32 = arith.constant 1 : i32
    %0 = arith.muli %arg0, %c1_i32 : i32
    %1 = arith.addi %0, %arg1 : i32
    %c0_i32 = arith.constant 0 : i32
    %c0_i32_0 = arith.constant 0 : i32
    return %1, %c0_i32 : i32, i32
  }
  func.func @transform_1(%arg0: i32, %arg1: i32) -> (i32, i32) {
    %c1_i32 = arith.constant 1 : i32
    %0 = arith.muli %arg0, %c1_i32 : i32
    %1 = arith.addi %0, %arg1 : i32
    %c0_i32 = arith.constant 0 : i32
    %c0_i32_0 = arith.constant 0 : i32
    return %1, %c0_i32 : i32, i32
  }
  func.func @transform_2(%arg0: i32, %arg1: i32) -> (i32, i32, i32) {
    %c0_i32 = arith.constant 0 : i32
    %c0_i32_0 = arith.constant 0 : i32
    %c0_i32_1 = arith.constant 0 : i32
    return %arg0, %c0_i32, %c0_i32_0 : i32, i32, i32
  }
}

</mosaic_0001>

<bundles_post_ra>
// kernel: tpu_custom_call.1
= control target key start
LH: loop header
LB: loop body
LE: loop exit
PB: predicated region body
PF: predicated region fallthrough
CT: control target
= control target key end

     0   :  { %7 = vsyncpa [#allocation3], 0  ;;  %s222_s0 = inlined_call_operand.hbm [shape: f32[16,128], index: 0, kind: input, shape index: {}]   ;;  %s223_s1 = inlined_call_operand.hbm [shape: f32[16,128], index: 1, kind: input, shape index: {}]   ;;  %s224_s2 = inlined_call_operand.hbm [shape: f32[1,8,128], index: 2, kind: output, shape index: {}]  }
   0x1   :  { %8 = vsyncpa [#allocation6], 0 }
   0x2   :  { %9 = vsyncpa [#allocation4], 0  ;;  %s193_s9 = smov [#allocation2]  }
   0x3   :  { %s19_s10 = sshll.u32 %s193_s9, 4  ;;  %s20_s10 = int_to_ptr.vmem [resolvable:$true] %s19_s10 }
   0x4   :  { %s135_s11 = scalar_lea.vmem %s20_s10, 256  ;;  %p140_p1 = scmp.lt.s32.totalorder %s20_s10, %s20_s10 }
   0x5   :  { %p136_p0 = scmp.ne.s32.totalorder %s20_s10, %s135_s11  ;;  %p141_p2 = scmp.lt.s32.totalorder %s135_s11, %s135_s11 }
   0x7   :  { %p142_p3 = por %p141_p2, %p140_p1 }
   0x9   :  { %p143_p4 = pnand %p142_p3, %p136_p0 }
   0xb   :  { %146 = shalt.err (!%p143_p4)
}
   0xc   :  { %s194_s12 = smov 128   ;;  %s195_s13 = smov 8  }
   0xd   :  { %25 = dma.hbm_to_vmem [thread:$0]  %s222_s0, 256, %s20_s10, [#allocation3], %s194_s12, %s194_s12, %s195_s13  }
   0xe   :  { %s196_s16 = smov [#allocation5]  }
   0xf   :  { %s35_s17 = sshll.u32 %s196_s16, 4  ;;  %s36_s17 = int_to_ptr.vmem [resolvable:$true] %s35_s17 }
  0x10   :  { %s155_s18 = scalar_lea.vmem %s36_s17, 256  ;;  %p160_p6 = scmp.lt.s32.totalorder %s36_s17, %s36_s17 }
  0x11   :  { %p156_p5 = scmp.ne.s32.totalorder %s36_s17, %s155_s18  ;;  %p161_p7 = scmp.lt.s32.totalorder %s155_s18, %s155_s18 }
  0x13   :  { %p162_p8 = por %p161_p7, %p160_p6 }
  0x15   :  { %p163_p9 = pnand %p162_p8, %p156_p5 }
  0x17   :  { %166 = shalt.err (!%p163_p9)
}
  0x18   :  { %41 = dma.hbm_to_vmem [thread:$0]  %s223_s1, 256, %s36_s17, [#allocation6], %s194_s12, %s194_s12, %s195_s13  }
  0x19   :  { %187 = dma.done.wait [#allocation3], 256  }
  0x1a   :  { %188 = vsyncadd [#allocation3], 4294967040 }
  0x1b   :  { %189 = dma.done.wait [#allocation6], 256  }
  0x1c   :  { %190 = vsyncadd [#allocation6], 4294967040  ;;  %v57_v0 = vld [vmem:[#allocation2] sm:$0xff]  ;;  %v58_v1 = vld [vmem:[#allocation2 + $0x8] sm:$0xff]  ;;  %s197_s0 = smov [#allocation7]  }
  0x1d   :  { %119 = vlog2.f32 %v57_v0  ;;  %v73_v2 = vsub.f32 1.0, %v57_v0  ;;  %v74_v3 = vsub.f32 1.0, %v58_v1  ;;  %v59_v4 = vld [vmem:[#allocation5] sm:$0xff]  ;;  %v60_v5 = vld [vmem:[#allocation5 + $0x8] sm:$0xff]  ;;  %s103_s1 = sshll.u32 %s197_s0, 4  ;;  %s104_s1 = int_to_ptr.vmem [resolvable:$true] %s103_s1 }
  0x1e   :  { %121 = vlog2.f32 %v58_v1  ;;  %v61_v6 = vsub.f32 %v59_v4, %v57_v0  ;;  %v62_v7 = vsub.f32 %v60_v5, %v58_v1  ;;  %v85_v19 = vsub.f32 1.0, %v59_v4  ;;  %s167_s21 = scalar_lea.vmem %s104_s1, 128  ;;  %p172_p11 = scmp.lt.s32.totalorder %s104_s1, %s104_s1 }
  0x1f   :  { %123 = vlog2.f32 %v73_v2  ;;  %v86_v23 = vsub.f32 1.0, %v60_v5  ;;  %p168_p10 = scmp.ne.s32.totalorder %s104_s1, %s167_s21  ;;  %p173_p12 = scmp.lt.s32.totalorder %s167_s21, %s167_s21 }
  0x20   :  { %125 = vlog2.f32 %v74_v3  ;;  %v63_v8 = vand.u32 2147483647, %v61_v6  ;;  %v64_v10 = vand.u32 2147483647, %v62_v7 }
  0x21   :  { %p174_p13 = por %p173_p12, %p172_p11 }
  0x22   :  { %v65_v16 = vadd.f32 0.01, %v63_v8  ;;  %v66_v20 = vadd.f32 0.01, %v64_v10 }
  0x23   :  { %p175_p0 = pnand %p174_p13, %p168_p10 }
  0x24   :  { %v81_v28 = vsub.f32 0.0, %v65_v16  ;;  %v82_v30 = vsub.f32 0.0, %v66_v20 }
  0x2a   :  { %v120_v9 = vpop.eup %119 }
  0x2b   :  { %v122_v11 = vpop.eup %121  ;;  %v68_v12 = vmul.f32 0.6931472, %v120_v9 }
  0x2c   :  { %v124_v13 = vpop.eup %123  ;;  %v70_v14 = vmul.f32 0.6931472, %v122_v11 }
  0x2d   :  { %v126_v15 = vpop.eup %125  ;;  %v71_v17 = vmax.f32 %v68_v12, -100.0  ;;  %v76_v18 = vmul.f32 0.6931472, %v124_v13 }
  0x2e   :  { %v72_v21 = vmax.f32 %v70_v14, -100.0  ;;  %v78_v22 = vmul.f32 0.6931472, %v126_v15 }
  0x2f   :  { %v79_v24 = vmax.f32 %v76_v18, -100.0  ;;  %v83_v25 = vmul.f32 %v71_v17, %v59_v4 }
  0x30   :  { %v80_v26 = vmax.f32 %v78_v22, -100.0  ;;  %v84_v27 = vmul.f32 %v72_v21, %v60_v5 }
  0x31   :  { %v87_v29 = vmul.f32 %v85_v19, %v79_v24 }
  0x32   :  { %v88_v31 = vmul.f32 %v86_v23, %v80_v26 }
  0x33   :  { %v89_v32 = vadd.f32 %v87_v29, %v83_v25 }
  0x34   :  { %v90_v33 = vadd.f32 %v88_v31, %v84_v27 }
  0x35   :  { %v91_v34 = vmul.f32 %v89_v32, %v81_v28 }
  0x36   :  { %v92_v35 = vmul.f32 %v90_v33, %v82_v30 }
  0x38   :  { %v93_v36 = vadd.f32 %v92_v35, %v91_v34 }
  0x3a   :  { %96 = vst [vmem:[#allocation7] sm:$0xff] %v93_v36 }
  0x3b   :  { %178 = shalt.err (!%p175_p0)
}
  0x3c   :  { %106 = dma.vmem_to_hbm [thread:$0]  %s104_s1, 128, %s224_s2, [#allocation4]  }
  0x3d   :  { %191 = dma.done.wait [#allocation4], 128  }
  0x3e   :  { %192 = vsyncadd [#allocation4], 4294967168 }
  0x3f   :  { %110 = vsyncpa [#allocation3], 1 }
  0x40   :  { %111 = vsyncpa [#allocation6], 1 }
  0x41   :  { %112 = vsyncpa [#allocation4], 1 }

</bundles_post_ra>
